<compile_context>
chip_gen: v6e
topology: v6e:2x2x1
jax: 0.10.0
libtpu: 0.0.40
codegen_flags: <defaults>
</compile_context>

<pallas_src>
import functools

import jax
import jax.numpy as jnp
from jax.experimental import pallas as pl
from jax.experimental.pallas import tpu as pltpu


_TARGET_BLOCK_ELEMS = 512 * 1024       # ~2 MiB f32 / ~1 MiB bf16 per input block
_VMEM_LIMIT_BYTES = 32 * 1024 * 1024   # safe on v5e / v6e / v7x


def _pick_tm(n_rows, d):
    """Row-tile size: big enough to amortize per-step overhead, VMEM-safe."""
    tm = max(1, _TARGET_BLOCK_ELEMS // d)
    if tm >= n_rows:
        return n_rows                  # one block covers everything (tiny input)
    return max(8, (tm // 8) * 8)       # sublane-aligned block rows


def _rmsnorm_kernel(x_ref, w_ref, o_ref, *, eps):
    """Plain path: the full d_model sits on the lane axis of each block."""
    x = x_ref[...].astype(jnp.float32)               # (tm, D)
    w = w_ref[...].astype(jnp.float32)               # (1, D)
    ms = jnp.mean(x * x, axis=-1, keepdims=True)     # (tm, 1)
    inv = jax.lax.rsqrt(ms + eps)
    o_ref[...] = (x * inv * w).astype(o_ref.dtype)


def _rmsnorm_folded_kernel(x_ref, w_ref, o_ref, *, eps, d, k):
    """Folded path: k logical rows of width d share one 128-lane row.

    The per-row reduction is done per d-lane segment with static lane slices,
    entirely in f32 on the VPU/XLU (exact; no matmul precision concerns).
    """
    x = x_ref[...].astype(jnp.float32)               # (tm, k*d)
    w = w_ref[...].astype(jnp.float32)               # (1, k*d)  weight tiled k times
    outs = []
    for s in range(k):                               # k is a small static int
        xs = x[:, s * d:(s + 1) * d]                 # (tm, d)
        ms = jnp.mean(xs * xs, axis=-1, keepdims=True)
        inv = jax.lax.rsqrt(ms + eps)
        outs.append(xs * inv)
    out = jnp.concatenate(outs, axis=-1) * w         # (tm, k*d)
    o_ref[...] = out.astype(o_ref.dtype)


def _call(kernel, x2d, w2d, tm, cost):
    n_rows, d = x2d.shape
    grid = (pl.cdiv(n_rows, tm),)
    return pl.pallas_call(
        kernel,
        out_shape=jax.ShapeDtypeStruct((n_rows, d), x2d.dtype),
        grid_spec=pltpu.PrefetchScalarGridSpec(
            num_scalar_prefetch=0,
            grid=grid,
            in_specs=[
                pl.BlockSpec((tm, d), lambda i: (i, 0)),
                pl.BlockSpec((1, d), lambda i: (0, 0)),
            ],
            out_specs=pl.BlockSpec((tm, d), lambda i: (i, 0)),
        ),
        compiler_params=pltpu.CompilerParams(
            dimension_semantics=("parallel",),
            vmem_limit_bytes=_VMEM_LIMIT_BYTES,
        ),
        cost_estimate=cost,
    )(x2d, w2d)


def rmsnorm(x, weight, eps=1e-5):
    """RMSNorm over the last axis of x; matches the PyTorch module."""
    orig_shape = x.shape
    d_model = orig_shape[-1]
    n_rows = 1
    for s in orig_shape[:-1]:
        n_rows *= s

    x2d = x.reshape(n_rows, d_model)
    itemsize = jnp.dtype(x.dtype).itemsize
    cost = pl.CostEstimate(
        flops=3 * n_rows * d_model,
        transcendentals=n_rows,
        bytes_accessed=2 * n_rows * d_model * itemsize + d_model * itemsize,
    )

    # Lane-dense fold for small d_model (avoids 128-lane HBM padding + masked
    # partial stores).  Applies when d_model divides 128 and is >= 8.
    fold = (d_model < 128) and (128 % d_model == 0) and (d_model >= 8) and (n_rows > 1)
    if fold:
        k = 128 // d_model
        kd = 128
        n_rows_p = ((n_rows + k - 1) // k) * k
        if n_rows_p != n_rows:
            x2d = jnp.pad(x2d, ((0, n_rows_p - n_rows), (0, 0)))
        rows = n_rows_p // k
        xf = x2d.reshape(rows, kd)
        wf = jnp.tile(weight.reshape(1, d_model), (1, k))
        tm = _pick_tm(rows, kd)
        kern = functools.partial(_rmsnorm_folded_kernel, eps=eps, d=d_model, k=k)
        out = _call(kern, xf, wf, tm, cost)
        out = out.reshape(n_rows_p, d_model)[:n_rows]
        return out.reshape(orig_shape)

    # Plain path.
    w2d = weight.reshape(1, d_model)
    tm = _pick_tm(n_rows, d_model)
    kern = functools.partial(_rmsnorm_kernel, eps=eps)
    out = _call(kern, x2d, w2d, tm, cost)
    return out.reshape(orig_shape)


def _reference(x, weight, eps):
    xf = x.astype(jnp.float32)
    ms = jnp.mean(xf * xf, axis=-1, keepdims=True)
    return (xf * jax.lax.rsqrt(ms + eps) * weight.astype(jnp.float32)).astype(x.dtype)


if __name__ == "__main__":
    key = jax.random.PRNGKey(0)
    eps = 1e-5
    k0, k1 = jax.random.split(key)

    # 1) Module-sized test (d_model=32): exercises the lane-dense folded path.
    batch, seq, d_model = 2, 8, 32
    x_small = jax.random.normal(k0, (batch, seq, d_model), dtype=jnp.float32)
    w_small = jnp.ones((d_model,), dtype=jnp.float32)   # module init: torch.ones(d_model)
    out_small = jax.block_until_ready(rmsnorm(x_small, w_small, eps=eps))
    ref_small = _reference(x_small, w_small, eps)
    assert out_small.shape == x_small.shape
    assert jnp.allclose(out_small, ref_small, atol=1e-5, rtol=1e-5), "folded-path mismatch"

    # 2) Wider d_model: exercises the plain (lane-wide) path.
    d_big = 256
    x_big = jax.random.normal(k1, (batch, seq, d_big), dtype=jnp.float32)
    w_big = jnp.ones((d_big,), dtype=jnp.float32)
    out_big = jax.block_until_ready(rmsnorm(x_big, w_big, eps=eps))
    ref_big = _reference(x_big, w_big, eps)
    assert jnp.allclose(out_big, ref_big, atol=1e-5, rtol=1e-5), "plain-path mismatch"

    print("KERNEL_OK")
</pallas_src>

<mosaic_0001>
module attributes {stable_mosaic.version = 11 : i64} {
  func.func @_rmsnorm_folded_kernel(%arg0: i32, %arg1: memref<4x128xf32, #tpu.memory_space<vmem>>, %arg2: memref<1x128xf32, #tpu.memory_space<vmem>>, %arg3: memref<4x128xf32, #tpu.memory_space<vmem>>) attributes {dimension_semantics = [#tpu.dimension_semantics<parallel>], iteration_bounds = array<i64: 1>, scalar_prefetch = 0 : i64, scratch_operands = 0 : i64, tpu.core_type = #tpu.core_type<tc>, window_params = [{transform_indices = @transform_0, window_bounds = array<i64: 4, 128>}, {pipeline_mode = #tpu.pipeline_mode<synchronous>, transform_indices = @transform_1, window_bounds = array<i64: 1, 128>}, {transform_indices = @transform_2, window_bounds = array<i64: 4, 128>}]} {
    %c0 = arith.constant 0 : index
    %c0_0 = arith.constant 0 : index
    %0 = vector.load %arg1[%c0, %c0_0] : memref<4x128xf32, #tpu.memory_space<vmem>>, vector<4x128xf32>
    %c0_1 = arith.constant 0 : index
    %c0_2 = arith.constant 0 : index
    %1 = vector.load %arg2[%c0_1, %c0_2] : memref<1x128xf32, #tpu.memory_space<vmem>>, vector<1x128xf32>
    %2 = vector.extract_strided_slice %0 {offsets = [0, 0], sizes = [4, 32], strides = [1, 1]} : vector<4x128xf32> to vector<4x32xf32>
    %3 = arith.mulf %2, %2 : vector<4x32xf32>
    %cst = arith.constant dense<0.000000e+00> : vector<4xf32>
    %4 = vector.multi_reduction <add>, %3, %cst [1] : vector<4x32xf32> to vector<4xf32>
    %5 = vector.shape_cast %4 : vector<4xf32> to vector<4x1xf32>
    %cst_3 = arith.constant 3.200000e+01 : f32
    %6 = vector.broadcast %cst_3 : f32 to vector<4x1xf32>
    %7 = arith.divf %5, %6 : vector<4x1xf32>
    %cst_4 = arith.constant 9.99999974E-6 : f32
    %8 = vector.broadcast %cst_4 : f32 to vector<4x1xf32>
    %9 = arith.addf %7, %8 : vector<4x1xf32>
    %10 = math.rsqrt %9 : vector<4x1xf32>
    %11 = vector.broadcast %10 : vector<4x1xf32> to vector<4x32xf32>
    %12 = arith.mulf %2, %11 : vector<4x32xf32>
    %13 = vector.extract_strided_slice %0 {offsets = [0, 32], sizes = [4, 32], strides = [1, 1]} : vector<4x128xf32> to vector<4x32xf32>
    %14 = arith.mulf %13, %13 : vector<4x32xf32>
    %cst_5 = arith.constant dense<0.000000e+00> : vector<4xf32>
    %15 = vector.multi_reduction <add>, %14, %cst_5 [1] : vector<4x32xf32> to vector<4xf32>
    %16 = vector.shape_cast %15 : vector<4xf32> to vector<4x1xf32>
    %cst_6 = arith.constant 3.200000e+01 : f32
    %17 = vector.broadcast %cst_6 : f32 to vector<4x1xf32>
    %18 = arith.divf %16, %17 : vector<4x1xf32>
    %cst_7 = arith.constant 9.99999974E-6 : f32
    %19 = vector.broadcast %cst_7 : f32 to vector<4x1xf32>
    %20 = arith.addf %18, %19 : vector<4x1xf32>
    %21 = math.rsqrt %20 : vector<4x1xf32>
    %22 = vector.broadcast %21 : vector<4x1xf32> to vector<4x32xf32>
    %23 = arith.mulf %13, %22 : vector<4x32xf32>
    %24 = vector.extract_strided_slice %0 {offsets = [0, 64], sizes = [4, 32], strides = [1, 1]} : vector<4x128xf32> to vector<4x32xf32>
    %25 = arith.mulf %24, %24 : vector<4x32xf32>
    %cst_8 = arith.constant dense<0.000000e+00> : vector<4xf32>
    %26 = vector.multi_reduction <add>, %25, %cst_8 [1] : vector<4x32xf32> to vector<4xf32>
    %27 = vector.shape_cast %26 : vector<4xf32> to vector<4x1xf32>
    %cst_9 = arith.constant 3.200000e+01 : f32
    %28 = vector.broadcast %cst_9 : f32 to vector<4x1xf32>
    %29 = arith.divf %27, %28 : vector<4x1xf32>
    %cst_10 = arith.constant 9.99999974E-6 : f32
    %30 = vector.broadcast %cst_10 : f32 to vector<4x1xf32>
    %31 = arith.addf %29, %30 : vector<4x1xf32>
    %32 = math.rsqrt %31 : vector<4x1xf32>
    %33 = vector.broadcast %32 : vector<4x1xf32> to vector<4x32xf32>
    %34 = arith.mulf %24, %33 : vector<4x32xf32>
    %35 = vector.extract_strided_slice %0 {offsets = [0, 96], sizes = [4, 32], strides = [1, 1]} : vector<4x128xf32> to vector<4x32xf32>
    %36 = arith.mulf %35, %35 : vector<4x32xf32>
    %cst_11 = arith.constant dense<0.000000e+00> : vector<4xf32>
    %37 = vector.multi_reduction <add>, %36, %cst_11 [1] : vector<4x32xf32> to vector<4xf32>
    %38 = vector.shape_cast %37 : vector<4xf32> to vector<4x1xf32>
    %cst_12 = arith.constant 3.200000e+01 : f32
    %39 = vector.broadcast %cst_12 : f32 to vector<4x1xf32>
    %40 = arith.divf %38, %39 : vector<4x1xf32>
    %cst_13 = arith.constant 9.99999974E-6 : f32
    %41 = vector.broadcast %cst_13 : f32 to vector<4x1xf32>
    %42 = arith.addf %40, %41 : vector<4x1xf32>
    %43 = math.rsqrt %42 : vector<4x1xf32>
    %44 = vector.broadcast %43 : vector<4x1xf32> to vector<4x32xf32>
    %45 = arith.mulf %35, %44 : vector<4x32xf32>
    %46 = tpu.concatenate %12, %23, %34, %45 in 1 : vector<4x32xf32>, vector<4x32xf32>, vector<4x32xf32>, vector<4x32xf32> -> vector<4x128xf32>
    %47 = vector.broadcast %1 : vector<1x128xf32> to vector<4x128xf32>
    %48 = arith.mulf %46, %47 : vector<4x128xf32>
    %c0_14 = arith.constant 0 : index
    %c0_15 = arith.constant 0 : index
    %49 = vector.load %arg3[%c0_14, %c0_15] : memref<4x128xf32, #tpu.memory_space<vmem>>, vector<4x128xf32>
    tpu.vector_store %arg3[%c0_14, %c0_15], %48 {strides = array<i32>} : memref<4x128xf32, #tpu.memory_space<vmem>>, vector<4x128xf32>,
    return
  }
  func.func @transform_0(%arg0: i32) -> (i32, i32) {
    %c0_i32 = arith.constant 0 : i32
    %c0_i32_0 = arith.constant 0 : i32
    return %arg0, %c0_i32 : i32, i32
  }
  func.func @transform_1(%arg0: i32) -> (i32, i32) {
    %c0_i32 = arith.constant 0 : i32
    %c0_i32_0 = arith.constant 0 : i32
    %c0_i32_1 = arith.constant 0 : i32
    return %c0_i32, %c0_i32_0 : i32, i32
  }
  func.func @transform_2(%arg0: i32) -> (i32, i32) {
    %c0_i32 = arith.constant 0 : i32
    %c0_i32_0 = arith.constant 0 : i32
    return %arg0, %c0_i32 : i32, i32
  }
}

</mosaic_0001>

<bundles_post_ra>
// kernel: tpu_custom_call.1
= control target key start
LH: loop header
LB: loop body
LE: loop exit
PB: predicated region body
PF: predicated region fallthrough
CT: control target
= control target key end

     0   :  { %7 = vsyncpa [#allocation3], 0  ;;  %s183_s0 = inlined_call_operand.hbm [shape: f32[4,128], index: 0, kind: input, shape index: {}]   ;;  %s184_s1 = inlined_call_operand.vmem [shape: f32[1,128], index: 1, kind: input, shape index: {}]   ;;  %s185_s2 = inlined_call_operand.hbm [shape: f32[4,128], index: 2, kind: output, shape index: {}]  }
   0x1   :  { %8 = vsyncpa [#allocation4], 0  ;;  %s154_s9 = smov [#allocation2]  }
   0x2   :  { %s15_s10 = sshll.u32 %s154_s9, 4  ;;  %s16_s10 = int_to_ptr.vmem [resolvable:$true] %s15_s10 }
   0x3   :  { %s118_s11 = scalar_lea.vmem %s16_s10, 64  ;;  %p123_p1 = scmp.lt.s32.totalorder %s16_s10, %s16_s10 }
   0x4   :  { %p119_p0 = scmp.ne.s32.totalorder %s16_s10, %s118_s11  ;;  %p124_p2 = scmp.lt.s32.totalorder %s118_s11, %s118_s11 }
   0x6   :  { %p125_p3 = por %p124_p2, %p123_p1 }
   0x8   :  { %p126_p4 = pnand %p125_p3, %p119_p0 }
   0xa   :  { %129 = shalt.err (!%p126_p4)
}
   0xb   :  { %18 = dma.hbm_to_vmem [thread:$0]  %s183_s0, 64, %s16_s10, [#allocation3]  }
   0xc   :  { %150 = dma.done.wait [#allocation3], 64  }
   0xd   :  { %151 = vsyncadd [#allocation3], 4294967232  ;;  %v24_v0 = vld [vmem:[#allocation2] sm:$0xf]  ;;  %s155_s14 = smov 96   ;;  %s156_s15 = smov 32  }
   0xe   :  { %v26_v1 = vmul.f32 %v24_v0, %v24_v0  ;;  %s157_s16 = smov 64   ;;  %vm27_vm0 = vcmask 257024   ;;  %vm67_vm1 = vcmask 261120   ;;  %vm69_vm2 = vcmask 523264   ;;  %v96_v29 = vld [vmem:[%s184_s1] ss:$0 sm:$0xff] }
   0xf   :  { %vm71_vm3 = vcmask 785408   ;;  %s158_s18 = smov [#allocation5]  }
  0x10   :  { %37 = vrot.lane.b32.xlu0 %v26_v1, %s155_s14  ;;  %57 = vrot.lane.b32.xlu1 %v26_v1, %s156_s15  ;;  %v28_v2 = vsel %vm27_vm0, %v26_v1, 0.0  ;;  %s87_s19 = sshll.u32 %s158_s18, 4  ;;  %s88_s19 = int_to_ptr.vmem [resolvable:$true] %s87_s19 }
  0x11   :  { %s130_s20 = scalar_lea.vmem %s88_s19, 64  ;;  %p135_p6 = scmp.lt.s32.totalorder %s88_s19, %s88_s19 }
  0x12   :  { %p131_p5 = scmp.ne.s32.totalorder %s88_s19, %s130_s20  ;;  %p136_p7 = scmp.lt.s32.totalorder %s130_s20, %s130_s20 }
  0x14   :  { %47 = vrot.lane.b32.xlu0 %v26_v1, %s157_s16  ;;  %p137_p8 = por %p136_p7, %p135_p6 }
  0x16   :  { %p138_p9 = pnand %p137_p8, %p131_p5 }
  0x34   :  { %29 = vadd.xlane.f32.xlu1 %v28_v2 }
  0x82   :  { %v38_v3 = vpop.permute.xlu0 %37  ;;  %v58_v4 = vpop.permute.xlu1 %57 }
  0x83   :  { %v40_v5 = vsel %vm27_vm0, %v38_v3, 0.0  ;;  %v60_v6 = vsel %vm27_vm0, %v58_v4, 0.0 }
  0x84   :  { %41 = vadd.xlane.f32.xlu0 %v40_v5  ;;  %61 = vadd.xlane.f32.xlu1 %v60_v6 }
  0x86   :  { %v48_v7 = vpop.permute.xlu0 %47 }
  0x87   :  { %v50_v8 = vsel %vm27_vm0, %v48_v7, 0.0 }
  0x88   :  { %51 = vadd.xlane.f32.xlu0 %v50_v8 }
  0xbd   :  { %v30_v9 = vpop.xlane.xlu1 %29 }
  0xbe   :  { %v32_v10 = vmul.f32 0.03125, %v30_v9 }
  0xc0   :  { %v33_v12 = vadd.f32 1e-05, %v32_v10 }
  0xc2   :  { %102 = vrsqrt.f32 %v33_v12 }
  0xcf   :  { %v103_v21 = vpop.eup %102 }
  0xd0   :  { %v35_v24 = vmul.f32 %v103_v21, %v24_v0 }
 0x10d   :  { %v42_v11 = vpop.xlane.xlu0 %41  ;;  %v62_v13 = vpop.xlane.xlu1 %61 }
 0x10e   :  { %v43_v14 = vmul.f32 0.03125, %v42_v11  ;;  %v63_v15 = vmul.f32 0.03125, %v62_v13 }
 0x110   :  { %v44_v16 = vadd.f32 1e-05, %v43_v14  ;;  %v64_v17 = vadd.f32 1e-05, %v63_v15 }
 0x111   :  { %v52_v18 = vpop.xlane.xlu0 %51 }
 0x112   :  { %104 = vrsqrt.f32 %v44_v16  ;;  %v53_v19 = vmul.f32 0.03125, %v52_v18 }
 0x113   :  { %106 = vrsqrt.f32 %v64_v17 }
 0x114   :  { %v54_v20 = vadd.f32 1e-05, %v53_v19 }
 0x116   :  { %108 = vrsqrt.f32 %v54_v20 }
 0x11f   :  { %v105_v22 = vpop.eup %104 }
 0x120   :  { %v107_v23 = vpop.eup %106  ;;  %v46_v25 = vmul.f32 %v105_v22, %v24_v0 }
 0x121   :  { %v66_v27 = vmul.f32 %v107_v23, %v24_v0 }
 0x122   :  { %v68_v30 = vsel %vm67_vm1, %v35_v24, %v46_v25 }
 0x123   :  { %v109_v26 = vpop.eup %108 }
 0x124   :  { %v56_v28 = vmul.f32 %v109_v26, %v24_v0 }
 0x126   :  { %v70_v31 = vsel %vm69_vm2, %v68_v30, %v56_v28 }
 0x127   :  { %v72_v32 = vsel %vm71_vm3, %v70_v31, %v66_v27 }
 0x128   :  { %v79_v33 = vmul.f32 %v96_v29, %v72_v32 }
 0x12a   :  { %80 = vst [vmem:[#allocation5] sm:$0xf] %v79_v33 }
 0x12b   :  { %141 = shalt.err (!%p138_p9)
}
 0x12c   :  { %90 = dma.vmem_to_hbm [thread:$0]  %s88_s19, 64, %s185_s2, [#allocation4]  }
 0x12d   :  { %152 = dma.done.wait [#allocation4], 64  }
 0x12e   :  { %153 = vsyncadd [#allocation4], 4294967232 }
 0x12f   :  { %94 = vsyncpa [#allocation3], 1 }
 0x130   :  { %95 = vsyncpa [#allocation4], 1 }

</bundles_post_ra>
